<compile_context>
chip_gen: v6e
topology: v6e:2x2x1
jax: 0.10.0
libtpu: 0.0.40
codegen_flags: <defaults>
</compile_context>

<pallas_src>
import functools

import jax
import jax.numpy as jnp
from jax.experimental import pallas as pl
from jax.experimental.pallas import tpu as pltpu

EPS = 1e-6


def _round_up(v, m):
    return ((v + m - 1) // m) * m


def sublayer_kernel(x_ref, w_ref, b_ref, gain_ref, bias_ref, o_ref, acc_ref,
                    *, d_model, block_k):
    """One (tm, D) row tile of:  out = LayerNorm(x @ W + b + x).

    Grid = (row_tiles, k_tiles).  The contraction axis streams the weight in
    (block_k, D) slabs; the f32 accumulator lives in VMEM scratch and the LN
    epilogue runs at the last K step.  When block_k == d_model (resident
    weight) the whole thing collapses to a single fused step.
    """
    num_k = d_model // block_k

    def epilogue(h):
        # Two-pass statistics: mean, then centered second moment (numerically
        # safer than E[x^2]-E[x]^2; the extra XLU reduction hides under MXU).
        mean = jnp.sum(h, axis=-1, keepdims=True) * (1.0 / d_model)
        diff = h - mean
        # torch.Tensor.std default: unbiased (divide by D-1); eps added to std.
        var = jnp.sum(diff * diff, axis=-1, keepdims=True) * (1.0 / (d_model - 1))
        inv = pl.reciprocal(jnp.sqrt(var) + EPS, approx=False)   # exact: 1e-4 tol
        out = diff * inv
        o_ref[...] = (out * gain_ref[...].astype(jnp.float32)
                      + bias_ref[...].astype(jnp.float32)).astype(o_ref.dtype)

    x = x_ref[...]                                               # (tm, block_k)

    if num_k == 1:
        # Resident-weight fast path: no scratch accumulator needed.
        h = (jnp.dot(x, w_ref[...], preferred_element_type=jnp.float32)
             + x.astype(jnp.float32)
             + b_ref[...].astype(jnp.float32))
        epilogue(h)
    else:
        k = pl.program_id(1)

        @pl.when(k == 0)
        def _():
            acc_ref[...] = jnp.zeros_like(acc_ref)

        # MXU partial product in the input dtype, f32 accumulation.
        acc_ref[...] += jnp.dot(x, w_ref[...], preferred_element_type=jnp.float32)
        # Residual: x's k-th feature chunk lands on the same output columns
        # (square weight), so add it into that lane-aligned column slab.
        col0 = pl.multiple_of(k * block_k, block_k)              # multiple of 128
        acc_ref[:, pl.ds(col0, block_k)] += x.astype(jnp.float32)

        @pl.when(k == num_k - 1)
        def _():
            epilogue(acc_ref[...] + b_ref[...].astype(jnp.float32))


def _choose_block_k(d_model, itemsize, weight_budget_bytes):
    """Largest K slab (multiple of 128, divisor of D) whose streamed (tk, D)
    double-buffer fits the weight budget; D itself if the weight can stay
    resident (or D is not a multiple of 128)."""
    if d_model % 128 != 0 or d_model * d_model * itemsize <= weight_budget_bytes:
        return d_model
    max_tk = max(128, (weight_budget_bytes // (2 * d_model * itemsize)) // 128 * 128)
    tk = 128
    for cand in range(256, min(d_model, max_tk) + 1, 128):
        if d_model % cand == 0:
            tk = cand
    return tk


def sublayer_forward(x, w_t, b, gain, bias, *, tm=512,
                     weight_budget_bytes=16 * 1024 * 1024):
    """out = LayerNorm(x @ w_t + b + x).

    x: (B, S, D); w_t: (D, D) laid out so y = x @ w_t (i.e. torch weight.T);
    b / gain / bias: (D,).  No padding and no output slice are performed.
    """
    B, S, D = x.shape
    N = B * S
    in_itemsize = jnp.dtype(x.dtype).itemsize
    out_itemsize = in_itemsize
    row_mult = 8 if in_itemsize >= 4 else 16      # (8,128) f32 / (16,128) bf16 tiles

    # --- K (contraction) tiling: stream the weight only when it would not fit
    # comfortably in VMEM (v7x has 64 MiB per TensorCore).
    tk = _choose_block_k(D, in_itemsize, weight_budget_bytes)
    nk = D // tk

    # --- Row tiling: big tiles amortize the ~0.35us per-grid-step overhead;
    # cap so there are >= 2 row tiles (keeps both v7x TensorCores busy).
    tm_eff = min(tm, max(row_mult, _round_up(pl.cdiv(N, 2), row_mult)))
    tm_eff = _round_up(tm_eff, row_mult)

    def vmem_estimate(tm_e):
        db = 2                                             # double-buffer depth
        x_b = db * tm_e * tk * in_itemsize                 # pipelined x chunks
        w_b = (1 if nk == 1 else db) * tk * D * in_itemsize
        vec_b = 3 * D * in_itemsize                        # b, gain, bias (1 buffer each)
        out_b = db * tm_e * D * out_itemsize
        acc_b = tm_e * D * 4 if nk > 1 else 0              # f32 accumulator scratch
        tmp_b = 3 * tm_e * D * 4                           # h / diff / out f32 temps
        return x_b + w_b + vec_b + out_b + acc_b + tmp_b

    fit_budget = 40 * 1024 * 1024                          # conservative vs. v7x 64 MiB
    while tm_eff > row_mult and vmem_estimate(tm_eff) > fit_budget:
        tm_eff = max(row_mult, _round_up(tm_eff // 2, row_mult))

    grid = (pl.cdiv(N, tm_eff), nk)

    x2 = x.reshape(N, D)                                   # free reshape, no pad / copy
    b2 = b.reshape(1, D)
    g2 = gain.reshape(1, D)
    i2 = bias.reshape(1, D)

    # Grid-invariant operands are single-buffered (constant index_map ->
    # double buffering buys nothing, single buffer halves their VMEM).
    invariant = dict(pipeline_mode=pl.Buffered(1))
    if nk == 1:
        w_spec = pl.BlockSpec((tk, D), lambda i, k: (0, 0), **invariant)
    else:
        w_spec = pl.BlockSpec((tk, D), lambda i, k: (k, 0))   # streamed -> keep 2 buffers

    acc_shape = (tm_eff, D) if nk > 1 else (row_mult, 128)    # dummy when unused

    vmem_limit = int(1.25 * vmem_estimate(tm_eff))
    vmem_limit = min(max(vmem_limit, 16 * 1024 * 1024), 64 * 1024 * 1024)

    cost = pl.CostEstimate(
        flops=2 * N * D * D + 10 * N * D,
        transcendentals=2 * N,
        bytes_accessed=(2 * N * D
                        + (grid[0] if nk > 1 else 1) * D * D
                        + 3 * D) * in_itemsize,
    )

    out = pl.pallas_call(
        functools.partial(sublayer_kernel, d_model=D, block_k=tk),
        out_shape=jax.ShapeDtypeStruct((N, D), x.dtype),
        grid_spec=pltpu.PrefetchScalarGridSpec(
            num_scalar_prefetch=0,
            grid=grid,
            in_specs=[
                pl.BlockSpec((tm_eff, tk), lambda i, k: (i, k)),           # x row/K chunk
                w_spec,                                                    # weight slab
                pl.BlockSpec((1, D), lambda i, k: (0, 0), **invariant),    # linear bias
                pl.BlockSpec((1, D), lambda i, k: (0, 0), **invariant),    # LN gain
                pl.BlockSpec((1, D), lambda i, k: (0, 0), **invariant),    # LN bias
            ],
            out_specs=pl.BlockSpec((tm_eff, D), lambda i, k: (i, 0)),
            scratch_shapes=[pltpu.VMEM(acc_shape, jnp.float32)],
        ),
        compiler_params=pltpu.CompilerParams(
            dimension_semantics=("parallel", "arbitrary"),   # rows shard across TCs
            vmem_limit_bytes=vmem_limit,
        ),
        cost_estimate=cost,
    )(x2, w_t, b2, g2, i2)

    return out.reshape(B, S, D)


def reference_forward(x, w_t, b, gain, bias):
    """Pure-JAX reference mirroring the PyTorch module semantics."""
    h = jnp.einsum("bsd,de->bse", x, w_t) + b + x
    mean = h.mean(axis=-1, keepdims=True)
    std = jnp.sqrt(((h - mean) ** 2).sum(-1, keepdims=True) / (h.shape[-1] - 1))
    return gain * (h - mean) / (std + EPS) + bias


if __name__ == "__main__":
    def run_case(d_model, **fwd_kwargs):
        B, S = 2, 8
        key = jax.random.PRNGKey(0)
        kx, kw, kb = jax.random.split(jax.random.fold_in(key, d_model), 3)

        x = jax.random.normal(kx, (B, S, d_model), dtype=jnp.float32)

        # Deterministic "sublayer" (Linear d_model->d_model) parameters.
        bound = 1.0 / (d_model ** 0.5)
        w = jax.random.uniform(kw, (d_model, d_model), minval=-bound, maxval=bound,
                               dtype=jnp.float32)        # torch Linear weight (out, in)
        w_t = w.T                                        # so y = x @ w_t
        b = jax.random.uniform(kb, (d_model,), minval=-bound, maxval=bound,
                               dtype=jnp.float32)

        # LayerNormalization parameters (as in __init__: ones / zeros).
        gain = jnp.ones((d_model,), dtype=jnp.float32)
        bias = jnp.zeros((d_model,), dtype=jnp.float32)

        out = jax.block_until_ready(
            sublayer_forward(x, w_t, b, gain, bias, **fwd_kwargs))
        ref = reference_forward(x, w_t, b, gain, bias)
        assert out.shape == (B, S, d_model)
        return out, ref

    # Case 1: d_model = 32 (small demo scale) -> resident-weight fast path.
    out, ref = run_case(32)
    assert jnp.allclose(out, ref, atol=1e-4, rtol=1e-4), "mismatch (resident path)"

    # Case 2: d_model = 256 with a tiny weight budget to force the K-streaming
    # path ((128, 256) weight slabs + f32 VMEM accumulator).  Slightly looser
    # tolerance only covers the different K-accumulation order.
    out2, ref2 = run_case(256, weight_budget_bytes=64 * 1024)
    assert jnp.allclose(out2, ref2, atol=1e-3, rtol=1e-3), "mismatch (streaming path)"

    print("KERNEL_OK")
</pallas_src>

<mosaic_0001>
module attributes {stable_mosaic.version = 11 : i64} {
  func.func @sublayer_kernel(%arg0: i32, %arg1: i32, %arg2: memref<8x32xf32, #tpu.memory_space<vmem>>, %arg3: memref<32x32xf32, #tpu.memory_space<vmem>>, %arg4: memref<1x32xf32, #tpu.memory_space<vmem>>, %arg5: memref<1x32xf32, #tpu.memory_space<vmem>>, %arg6: memref<1x32xf32, #tpu.memory_space<vmem>>, %arg7: memref<8x32xf32, #tpu.memory_space<vmem>>, %arg8: memref<8x128xf32, #tpu.memory_space<vmem>>) attributes {dimension_semantics = [#tpu.dimension_semantics<parallel>, #tpu.dimension_semantics<arbitrary>], iteration_bounds = array<i64: 2, 1>, scalar_prefetch = 0 : i64, scratch_operands = 1 : i64, tpu.core_type = #tpu.core_type<tc>, window_params = [{transform_indices = @transform_0, window_bounds = array<i64: 8, 32>}, {pipeline_mode = #tpu.pipeline_mode<synchronous>, transform_indices = @transform_1, window_bounds = array<i64: 32, 32>}, {pipeline_mode = #tpu.pipeline_mode<synchronous>, transform_indices = @transform_2, window_bounds = array<i64: 1, 32>}, {pipeline_mode = #tpu.pipeline_mode<synchronous>, transform_indices = @transform_3, window_bounds = array<i64: 1, 32>}, {pipeline_mode = #tpu.pipeline_mode<synchronous>, transform_indices = @transform_4, window_bounds = array<i64: 1, 32>}, {transform_indices = @transform_5, window_bounds = array<i64: 8, 32>}]} {
    %c0 = arith.constant 0 : index
    %c0_0 = arith.constant 0 : index
    %0 = vector.load %arg2[%c0, %c0_0] : memref<8x32xf32, #tpu.memory_space<vmem>>, vector<8x32xf32>
    %c0_1 = arith.constant 0 : index
    %c0_2 = arith.constant 0 : index
    %1 = vector.load %arg3[%c0_1, %c0_2] : memref<32x32xf32, #tpu.memory_space<vmem>>, vector<32x32xf32>
    %cst = arith.constant dense<0.000000e+00> : vector<8x32xf32>
    %2 = tpu.matmul %0, %1, %cst {dimension_numbers = #tpu.dot_dimension_numbers<[1], [0], [0], [1], [0, 0, 1, 1], [], []>} : vector<8x32xf32>, vector<32x32xf32>, vector<8x32xf32> -> vector<8x32xf32>
    %3 = arith.addf %2, %0 : vector<8x32xf32>
    %c0_3 = arith.constant 0 : index
    %c0_4 = arith.constant 0 : index
    %4 = vector.load %arg4[%c0_3, %c0_4] : memref<1x32xf32, #tpu.memory_space<vmem>>, vector<1x32xf32>
    %5 = vector.broadcast %4 : vector<1x32xf32> to vector<8x32xf32>
    %6 = arith.addf %3, %5 : vector<8x32xf32>
    %cst_5 = arith.constant dense<0.000000e+00> : vector<8xf32>
    %7 = vector.multi_reduction <add>, %6, %cst_5 [1] : vector<8x32xf32> to vector<8xf32>
    %8 = vector.shape_cast %7 : vector<8xf32> to vector<8x1xf32>
    %cst_6 = arith.constant 3.125000e-02 : f32
    %9 = vector.broadcast %cst_6 : f32 to vector<8x1xf32>
    %10 = arith.mulf %8, %9 : vector<8x1xf32>
    %11 = vector.broadcast %10 : vector<8x1xf32> to vector<8x32xf32>
    %12 = arith.subf %6, %11 : vector<8x32xf32>
    %13 = arith.mulf %12, %12 : vector<8x32xf32>
    %cst_7 = arith.constant dense<0.000000e+00> : vector<8xf32>
    %14 = vector.multi_reduction <add>, %13, %cst_7 [1] : vector<8x32xf32> to vector<8xf32>
    %15 = vector.shape_cast %14 : vector<8xf32> to vector<8x1xf32>
    %cst_8 = arith.constant 0.0322580636 : f32
    %16 = vector.broadcast %cst_8 : f32 to vector<8x1xf32>
    %17 = arith.mulf %15, %16 : vector<8x1xf32>
    %18 = math.sqrt %17 : vector<8x1xf32>
    %cst_9 = arith.constant 9.99999997E-7 : f32
    %19 = vector.broadcast %cst_9 : f32 to vector<8x1xf32>
    %20 = arith.addf %18, %19 : vector<8x1xf32>
    %21 = tpu.reciprocal %20 : vector<8x1xf32> -> vector<8x1xf32>
    %22 = vector.broadcast %21 : vector<8x1xf32> to vector<8x32xf32>
    %23 = arith.mulf %12, %22 : vector<8x32xf32>
    %c0_10 = arith.constant 0 : index
    %c0_11 = arith.constant 0 : index
    %24 = vector.load %arg5[%c0_10, %c0_11] : memref<1x32xf32, #tpu.memory_space<vmem>>, vector<1x32xf32>
    %25 = vector.broadcast %24 : vector<1x32xf32> to vector<8x32xf32>
    %26 = arith.mulf %23, %25 : vector<8x32xf32>
    %c0_12 = arith.constant 0 : index
    %c0_13 = arith.constant 0 : index
    %27 = vector.load %arg6[%c0_12, %c0_13] : memref<1x32xf32, #tpu.memory_space<vmem>>, vector<1x32xf32>
    %28 = vector.broadcast %27 : vector<1x32xf32> to vector<8x32xf32>
    %29 = arith.addf %26, %28 : vector<8x32xf32>
    %c0_14 = arith.constant 0 : index
    %c0_15 = arith.constant 0 : index
    %30 = vector.load %arg7[%c0_14, %c0_15] : memref<8x32xf32, #tpu.memory_space<vmem>>, vector<8x32xf32>
    tpu.vector_store %arg7[%c0_14, %c0_15], %29 {strides = array<i32>} : memref<8x32xf32, #tpu.memory_space<vmem>>, vector<8x32xf32>,
    return
  }
  func.func @transform_0(%arg0: i32, %arg1: i32) -> (i32, i32) {
    %c0_i32 = arith.constant 0 : i32
    return %arg0, %arg1 : i32, i32
  }
  func.func @transform_1(%arg0: i32, %arg1: i32) -> (i32, i32) {
    %c0_i32 = arith.constant 0 : i32
    %c0_i32_0 = arith.constant 0 : i32
    %c0_i32_1 = arith.constant 0 : i32
    return %c0_i32, %c0_i32_0 : i32, i32
  }
  func.func @transform_2(%arg0: i32, %arg1: i32) -> (i32, i32) {
    %c0_i32 = arith.constant 0 : i32
    %c0_i32_0 = arith.constant 0 : i32
    %c0_i32_1 = arith.constant 0 : i32
    return %c0_i32, %c0_i32_0 : i32, i32
  }
  func.func @transform_3(%arg0: i32, %arg1: i32) -> (i32, i32) {
    %c0_i32 = arith.constant 0 : i32
    %c0_i32_0 = arith.constant 0 : i32
    %c0_i32_1 = arith.constant 0 : i32
    return %c0_i32, %c0_i32_0 : i32, i32
  }
  func.func @transform_4(%arg0: i32, %arg1: i32) -> (i32, i32) {
    %c0_i32 = arith.constant 0 : i32
    %c0_i32_0 = arith.constant 0 : i32
    %c0_i32_1 = arith.constant 0 : i32
    return %c0_i32, %c0_i32_0 : i32, i32
  }
  func.func @transform_5(%arg0: i32, %arg1: i32) -> (i32, i32) {
    %c0_i32 = arith.constant 0 : i32
    %c0_i32_0 = arith.constant 0 : i32
    return %arg0, %c0_i32 : i32, i32
  }
}

</mosaic_0001>

<bundles_post_ra>
// kernel: tpu_custom_call.1
= control target key start
LH: loop header
LB: loop body
LE: loop exit
PB: predicated region body
PF: predicated region fallthrough
CT: control target
= control target key end

     0   :  { %s971_s0 = inlined_call_operand.hbm [shape: f32[16,32], index: 0, kind: input, shape index: {}]   ;;  %s972_s1 = inlined_call_operand.hbm [shape: f32[32,32], index: 1, kind: input, shape index: {}]   ;;  %s973_s2 = inlined_call_operand.vmem [shape: f32[1,32], index: 2, kind: input, shape index: {}]   ;;  %s974_s3 = inlined_call_operand.vmem [shape: f32[1,32], index: 3, kind: input, shape index: {}]   ;;  %s975_s4 = inlined_call_operand.vmem [shape: f32[1,32], index: 4, kind: input, shape index: {}]   ;;  %s976_s5 = inlined_call_operand.hbm [shape: f32[16,32], index: 5, kind: output, shape index: {}]  }
   0x1   :  { %979 = sst [smem:[#allocation13_spill]] %s972_s1 }
   0x2   :  { %10 = vsyncpa [#allocation4], 0 }
   0x3   :  { %12 = vsyncpa [#allocation4 + $0x1], 0 }
   0x4   :  { %13 = vsyncpa [#allocation7], 0 }
   0x5   :  { %14 = vsyncpa [#allocation5], 0 }
   0x6   :  { %16 = vsyncpa [#allocation5 + $0x1], 0  ;;  %s787_s18 = smov 0   ;;  %s789_s19 = smov 0  }
   0x7   :  { %s791_s20 = smov 0   ;;  %s793_s21 = smov 0  }
   0x8   :  { %s795_s22 = smov 0   ;;  %s797_s23 = smov 0  }
   0x9 LB: > { %s494_s24 = sadd.s32 4294967295, %s748_s23   ;;  %s495_s25 = sadd.s32 4294967294, %s748_s23   ;;  %s748_s23 = sphi %s797_s23, %s22_s23   ;;  %s744_s22 = sphi %s795_s22, %s999_s22   ;;  %s740_s21 = sphi %s793_s21, %s998_s21   ;;  %s736_s20 = sphi %s791_s20, %s997_s20   ;;  %s732_s19 = sphi %s789_s19, %s996_s19   ;;  %s728_s18 = sphi %s787_s18, %s995_s18  }
   0xa   : > { %p56_p0 = scmp.ne.s32.totalorder %s732_s19, %s728_s18  ;;  %p821_p1 = scmp.eq.s32.totalorder %s494_s24, 0 }
   0xb   : > { %p825_p2 = scmp.eq.s32.totalorder %s494_s24, 1  ;;  %p170_p3 = scmp.eq.s32.totalorder %s495_s25, 1 }
   0xc   : > { %p831_p4 = por %p821_p1, %p56_p0  ;;  %p496_p5 = scmp.ge.s32.totalorder %s748_s23, 1 }
   0xd   : > { %p836_p6 = por %p170_p3, %p56_p0  ;;  %p177_p7 = scmp.lt.s32.totalorder %s748_s23, 3 }
   0xe   : > { %s982_s28 = scalar_select %p831_p4, 1, 0 }
   0xf   : > { %s983_s29 = scalar_select %p836_p6, 1, 0 }
  0x10   : > { %p841_p8 = pnand %p496_p5, %p177_p7  ;;  %s750_s6 = smov [#allocation6]  }
  0x11   : > { %s189_s7 = sshll.u32 %s750_s6, 4  ;;  %s34_s9 = sadd.s32 1, %s744_s22  ;;  %s190_s7 = int_to_ptr.vmem [resolvable:$true] %s189_s7 }
  0x12   : > { %p537_p9 = pneg %p841_p8  ;;  %s621_s10 = scalar_lea.vmem %s190_s7, 512 }
  0x13   : > { %p622_p13 = scmp.ne.s32.totalorder %s190_s7, %s621_s10  ;;  %p629_p5 = scmp.lt.s32.totalorder %s190_s7, %s190_s7 }
  0x14   : > { %p850_p11 = pnand %p537_p9, %p821_p1  ;;  %p630_p7 = scmp.lt.s32.totalorder %s621_s10, %s621_s10 }
  0x16   : > { %p612_p12 = pneg %p850_p11  ;;  %p631_p6 = por %p630_p7, %p629_p5 }
  0x18   : > { %p624_p0 = pnand %p622_p13, %p612_p12 }
  0x1a   : > { %p625_p3 = pneg %p624_p0 }
  0x1c   : > { %p632_p4 = pnand %p631_p6, %p625_p3 }
  0x1e   : > { %635 = shalt.err (!%p632_p4)
}
  0x1f   : > { %s751_s11 = smov 128   ;;  %s752_s12 = smov 8  }
  0x20   : > { %s986_s1 = sld [smem:[#allocation13_spill]]  ;;  %p36_p6 = scmp.ge.s32.totalorder %s34_s9, 2 }
  0x21   : > { %s43_s15 = sadd.s32 1, %s736_s20  ;;  %p50_p4 = scmp.ne.s32.totalorder %s736_s20, %s732_s19 }
  0x22   : > { %p51_p9 = scmp.eq.s32.totalorder %s748_s23, 0  ;;  %s1001_s9 = smov (%p36_p6, %s34_s9), 0 }
  0x23   : > { %987 = sst [smem:[#allocation12_spill]] %s1001_s9  ;;  %p874_p13 = por %p825_p2, %p50_p4 }
  0x24   : > { %p868_p12 = por %p51_p9, %p50_p4  ;;  %s38_s24 = ssub.s32 %s744_s22, %s1001_s9 }
  0x25   : > { %p550_p0 = scmp.lt.s32.totalorder %s748_s23, 2  ;;  %s212_s25 = sand.u32 1, %s736_s20  }
  0x26   : > { %540 = dma.hbm_to_vmem [thread:$0]  (!%p850_p11), %s986_s1, 512, %s190_s7, [#allocation7], %s751_s11, %s751_s11, %s752_s12  }
  0x27   : > { %p41_p11 = scmp.eq.s32.totalorder %s38_s24, 0  ;;  %s499_s6 = sshll.u32 %s212_s25, 3 }
  0x28   : > { %s500_s8 = sshll.u32 %s744_s22, 7  ;;  %s216_s13 = scalar_lea.vmem [#allocation3], %s499_s6 }
  0x29   : > { %s883_s7 = scalar_select %p41_p11, %s736_s20, %s43_s15  }
  0x2a   : > { %s222_s12 = scalar_lea.hbm %s971_s0, %s500_s8  ;;  %s224_s14 = sshll.u32 %s216_s13, 4  ;;  %s225_s14 = int_to_ptr.vmem [resolvable:$true] %s224_s14 }
  0x2b   : > { %p891_p2 = pnand %p550_p0, %p868_p12  ;;  %s213_s1 = scalar_lea.sflag [#allocation4], %s212_s25 }
  0x2c   : > { %s649_s24 = scalar_lea.vmem %s225_s14, 128  ;;  %s753_s15 = smov [#allocation3]  }
  0x2d   : > { %p638_p3 = pneg %p891_p2  ;;  %p650_p5 = scmp.ne.s32.totalorder %s225_s14, %s649_s24 }
  0x2e   : > { %s654_s9 = sshll.u32 %s753_s15, 4  ;;  %s655_s9 = int_to_ptr.vmem [resolvable:$false] %s654_s9 }
  0x2f   : > { %p652_p7 = pnand %p650_p5, %p638_p3  ;;  %s656_s8 = scalar_lea.vmem %s655_s9, 256 }
  0x30   : > { %p657_p4 = scmp.lt.s32.totalorder %s225_s14, %s655_s9  ;;  %p658_p9 = scmp.lt.s32.totalorder %s656_s8, %s649_s24 }
  0x31   : > { %p653_p6 = pneg %p652_p7 }
  0x32   : > { %p659_p11 = por %p658_p9, %p657_p4 }
  0x34   : > { %p660_p10 = pnand %p659_p11, %p653_p6 }
  0x36   : > { %663 = shalt.err (!%p660_p10)
}
  0x37   : > { %544 = dma.hbm_to_vmem [thread:$0]  (!%p891_p2), %s222_s12, 128, %s225_s14, %s213_s1  }
  0x38   : > { %233 = sbr.rel (%p841_p8) target bundleno = 609 (0x261), region = 40  ;;  %s902_s16 = sand.u32 (!%p841_p8), 1, %s732_s19  }
  0x39   : > { %s502_s25 = sshll.u32 (!%p841_p8), %s902_s16, 3  ;;  %s236_s6 = scalar_lea.sflag (!%p841_p8), [#allocation4], %s902_s16 }
  0x3a   : > { %s239_s9 = scalar_lea.vmem (!%p841_p8), [#allocation3], %s502_s25  ;;  %p991_p12 = scmp.ne.s32.totalorder (!%p841_p8), %s982_s28, 0 }
  0x3d   : > { %715 = dma.done.wait (%p991_p12), %s236_s6, 128  }
  0x3e   : > { %717 = vsyncadd (%p991_p12), %s236_s6, 4294967168 }
  0x3f   : > { %719 = dma.done.wait (%p821_p1), [#allocation7], 512  }
  0x40   : > { %721 = vsyncadd (%p821_p1), [#allocation7], 4294966784  ;;  %v754_v0 = vmov 0.0   ;;  %vm755_vm0 = vmmov 0   ;;  %v274_v1 = vld [vmem:[#allocation6 + $0x18] sm:$0xff]  ;;  %v273_v2 = vld [vmem:[#allocation6 + $0x10] sm:$0xff] }
  0x41   : > { %518 = vmatprep.subr.mxu0 %v754_v0  ;;  %526 = vmatprep.mubr.msk.f32.mxu0 %vm755_vm0, %v754_v0  ;;  %v272_v3 = vld [vmem:[#allocation6 + $0x8] sm:$0xff]  ;;  %v271_v4 = vld [vmem:[#allocation6] sm:$0xff]  ;;  %v270_v5 = vld [vmem:[%s239_s9] sm:$0xff]  ;;  %vm275_vm1 = vcmask 261120   ;;  %s510_s12 = sshll.u32 %s740_s21, 7  ;;  %s269_s13 = scalar_lea.vmem [#allocation8], %s502_s25 }
  0x42   : > { %519 = vmatpush3.msra.mxu0 %v274_v1  ;;  %v506_v7 = vld [vmem:[%s973_s2] ss:$0 sm:$0xff]  ;;  %s408_s14 = sshll.u32 %s269_s13, 4  ;;  %s406_s15 = scalar_lea.hbm %s976_s5, %s510_s12  ;;  %s409_s14 = int_to_ptr.vmem [resolvable:$true] %s408_s14 }
  0x43   : > { %520 = vmatprep.subr.mxu0 %v754_v0  ;;  %v507_v26 = vld [vmem:[%s974_s3] ss:$0 sm:$0xff]  ;;  %s395_s8 = scalar_lea.sflag [#allocation5], %s902_s16  ;;  %s664_s6 = scalar_lea.vmem %s409_s14, 128 }
  0x44   : > { %521 = vmatpush3.msra.mxu0 %v273_v2  ;;  %v508_v28 = vld [vmem:[%s975_s4] ss:$0 sm:$0xff]  ;;  %p665_p1 = scmp.ne.s32.totalorder %s409_s14, %s664_s6  ;;  %s756_s9 = smov [#allocation8]  }
  0x45   : > { %522 = vmatprep.subr.mxu0 %v754_v0  ;;  %s668_s21 = sshll.u32 %s756_s9, 4  ;;  %s669_s21 = int_to_ptr.vmem [resolvable:$false] %s668_s21 }
  0x46   : > { %523 = vmatpush3.msra.mxu0 %v272_v3  ;;  %p666_p8 = pnand %p665_p1, %p874_p13  ;;  %s670_s25 = scalar_lea.vmem %s669_s21, 256 }
  0x47   : > { %524 = vmatprep.subr.mxu0 %v754_v0  ;;  %p671_p0 = scmp.lt.s32.totalorder %s409_s14, %s669_s21  ;;  %p672_p2 = scmp.lt.s32.totalorder %s670_s25, %s664_s6 }
  0x48   : > { %525 = vmatpush3.msra.mxu0 %v271_v4  ;;  %p667_p10 = pneg %p666_p8 }
  0x49   : > { %527 = vmatmul.mubr.msk.f32.vlgmr.msra.gmra.mxu0 %vm275_vm1, %v270_v5  ;;  %p673_p3 = por %p672_p2, %p671_p0 }
  0x4b   : > { %p674_p5 = pnand %p673_p3, %p667_p10 }
 0x109   : > { %v345_v6 = vpop.f32.mrf.mxu0 }
 0x10a   : > { %v346_v8 = vadd.f32 %v345_v6, %v270_v5 }
 0x10b   : > { %v528_v9 = vpop.f32.mrf.mxu0 }
 0x10c   : > { %v356_v10 = vadd.f32 %v506_v7, %v346_v8 }
 0x10e   : > { %v357_v11 = vsel %vm275_vm1, %v356_v10, 0.0 }
 0x10f   : > { %358 = vadd.xlane.f32.xlu0 %v357_v11 }
 0x198   : > { %v359_v12 = vpop.xlane.xlu0 %358 }
 0x199   : > { %v360_v13 = vmul.f32 0.03125, %v359_v12 }
 0x19b   : > { %v361_v14 = vsub.f32 %v356_v10, %v360_v13 }
 0x19d   : > { %v362_v15 = vmul.f32 %v361_v14, %v361_v14 }
 0x19f   : > { %v363_v16 = vsel %vm275_vm1, %v362_v15, 0.0 }
 0x1a0   : > { %364 = vadd.xlane.f32.xlu0 %v363_v16 }
 0x229   : > { %v365_v17 = vpop.xlane.xlu0 %364 }
 0x22a   : > { %v366_v18 = vmul.f32 0.032258064, %v365_v17 }
 0x22c   : > { %606 = vrsqrt.f32 %v366_v18  ;;  %vm369_vm2 = vcmp.eq.f32.partialorder %v366_v18, inf  ;;  %v372_v21 = vand.u32 2147483648, %v366_v18  ;;  %vm371_vm3 = vcmp.eq.f32.partialorder %v366_v18, 0.0 }
 0x239   : > { %v607_v19 = vpop.eup %606 }
 0x23a   : > { %v368_v20 = vmul.f32 %v607_v19, %v366_v18 }
 0x23c   : > { %v370_v22 = vsel %vm369_vm2, %v366_v18, %v368_v20 }
 0x23d   : > { %v373_v23 = vsel %vm371_vm3, %v372_v21, %v370_v22 }
 0x23e   : > { %v374_v24 = vadd.f32 1e-06, %v373_v23 }
 0x240   : > { %608 = vrcp.f32 %v374_v24 }
 0x24d   : > { %v609_v25 = vpop.eup %608 }
 0x24e   : > { %v376_v27 = vmul.f32 %v609_v25, %v361_v14 }
 0x250   : > { %v384_v29 = vmul.f32 %v507_v26, %v376_v27 }
 0x252   : > { %v392_v30 = vadd.f32 %v508_v28, %v384_v29 }
 0x254   : > { %393 = vst.msk [vmem:[%s269_s13] sm:$0xff] %vm275_vm1, %v392_v30 }
 0x255   : > { %677 = shalt.err (!%p674_p5)
}
 0x256   : > { %s678_s1 = scalar_lea.hbm %s406_s15, 128  ;;  %s682_s28 = scalar_lea.hbm %s976_s5, 256 }
 0x257   : > { %p679_p7 = scmp.ne.s32.totalorder %s406_s15, %s678_s1  ;;  %p683_p9 = scmp.lt.s32.totalorder %s406_s15, %s976_s5 }
 0x258   : > { %p684_p11 = scmp.lt.s32.totalorder %s682_s28, %s678_s1 }
 0x259   : > { %p680_p6 = pnand %p679_p7, %p874_p13 }
 0x25a   : > { %p685_p12 = por %p684_p11, %p683_p9 }
 0x25b   : > { %p681_p4 = pneg %p680_p6 }
 0x25d   : > { %p686_p1 = pnand %p685_p12, %p681_p4 }
 0x25f   : > { %689 = shalt.err (!%p686_p1)
}
 0x260   : > { %535 = dma.vmem_to_hbm [thread:$0]  (%p874_p13), %s409_s14, 128, %s406_s15, %s395_s8  }
 0x261 PF: > { %s420_s11 = sand.u32 1, %s728_s18   ;;  %p992_p8 = scmp.ne.s32.totalorder %s983_s29, 0 }
 0x262   : > { %p993_p10 = scmp.ge.s32.totalorder %s748_s23, 2  ;;  %s421_s12 = scalar_lea.sflag [#allocation5], %s420_s11 }
 0x264   : > { %p546_p0 = pnand %p993_p10, %p992_p8 }
 0x266   : > { %p547_p2 = pneg %p546_p0 }
 0x268   : > { %723 = dma.done.wait (%p547_p2), %s421_s12, 128  }
 0x269   : > { %725 = vsyncadd (%p547_p2), %s421_s12, 4294967168  ;;  %s22_s23 = sadd.s32 1, %s748_s23   ;;  %s994_s17 = sld [smem:[#allocation12_spill]] }
 0x26a   : > { %p19_p3 = scmp.ge.s32.totalorder %s22_s23, 4   ;;  %s995_s18 = smov %s732_s19 }
 0x26b   : > { %s996_s19 = smov %s736_s20  ;;  %s997_s20 = smov %s883_s7 }
 0x26c   : > { %s998_s21 = smov %s744_s22  ;;  %21 = sbr.rel (!%p19_p3) target bundleno = 9 (0x9), region = 89 }
 0x26f   : > { %s999_s22 = smov %s994_s17 }
 0x271   :  { %426 = vsyncpa [#allocation4], 1 }
 0x272   :  { %428 = vsyncpa [#allocation4 + $0x1], 1 }
 0x273   :  { %429 = vsyncpa [#allocation7], 1 }
 0x274   :  { %430 = vsyncpa [#allocation5], 1 }
 0x275   :  { %432 = vsyncpa [#allocation5 + $0x1], 1 }

</bundles_post_ra>
